<compile_context>
chip_gen: v5e
topology: v5e:2x2
jax: 0.10.0
libtpu: 0.0.40
codegen_flags: <defaults>
</compile_context>

<pallas_src>
import math

import jax
import jax.numpy as jnp
from jax.experimental import pallas as pl
from jax.experimental.pallas import tpu as pltpu


# ----------------------------- kernel ----------------------------------------


def _make_kernel(scale, head_num, dh, memory_num):
    has_mem = memory_num > 0

    def kernel(*refs):
        if has_mem:
            (q_ref, k_ref, v_ref, bias_ref,
             wq_ref, wk_ref, wv_ref, wo_ref,
             kmem_ref, vmem_ref,
             out_ref, attn_ref,
             kup_ref, vup_ref) = refs
        else:
            (q_ref, k_ref, v_ref, bias_ref,
             wq_ref, wk_ref, wv_ref, wo_ref,
             out_ref, attn_ref,
             kup_ref, vup_ref) = refs
            kmem_ref = vmem_ref = None

        qi = pl.program_id(1)

        # Full-width K/V projections, once per batch element (q-tile 0), kept
        # resident in VMEM scratch across the (serial) q-tile axis.
        @pl.when(qi == 0)
        def _():
            kup_ref[...] = jnp.dot(k_ref[0], wk_ref[...],
                                   preferred_element_type=jnp.float32)
            vup_ref[...] = jnp.dot(v_ref[0], wv_ref[...],
                                   preferred_element_type=jnp.float32)

        # Full-width Q projection; fold 1/sqrt(dh) in here once instead of
        # scaling every [tq, Lk] / [tq, M] score block.
        q_up = jnp.dot(q_ref[0], wq_ref[...],
                       preferred_element_type=jnp.float32) * scale      # [tq, D]

        k_up = kup_ref[...]                                             # [Lk, D]
        v_up = vup_ref[...]                                             # [Lk, D]
        bias = bias_ref[0]              # [tq, Lk], 0.0 or -1e30 (additive mask)

        ctx_parts = []
        for h in range(head_num):
            sl = slice(h * dh, (h + 1) * dh)
            q_h = q_up[:, sl]           # [tq, dh]
            k_h = k_up[:, sl]           # [Lk, dh]
            v_h = v_up[:, sl]           # [Lk, dh]

            # scores against keys (NT matmul, no explicit transpose)
            s_kv = jax.lax.dot_general(
                q_h, k_h, (((1,), (1,)), ((), ())),
                preferred_element_type=jnp.float32) + bias              # [tq, Lk]

            if has_mem:
                s_mem = jax.lax.dot_general(
                    q_h, kmem_ref[h], (((1,), (1,)), ((), ())),
                    preferred_element_type=jnp.float32)                 # [tq, M]
                m = jnp.maximum(jnp.max(s_kv, axis=-1, keepdims=True),
                                jnp.max(s_mem, axis=-1, keepdims=True))
                p_kv = jnp.exp(s_kv - m)
                p_mem = jnp.exp(s_mem - m)
                denom = (jnp.sum(p_kv, axis=-1, keepdims=True)
                         + jnp.sum(p_mem, axis=-1, keepdims=True))
                inv = pl.reciprocal(denom, approx=True)                 # EUP
                a_kv = p_kv * inv
                a_mem = p_mem * inv
                ctx_h = (jnp.dot(a_kv, v_h,
                                 preferred_element_type=jnp.float32)
                         + jnp.dot(a_mem, vmem_ref[h],
                                   preferred_element_type=jnp.float32))  # [tq, dh]
                # single lane-dense store: [keys | memory] probabilities
                attn_ref[0, h] = jnp.concatenate([a_kv, a_mem], axis=-1)
            else:
                m = jnp.max(s_kv, axis=-1, keepdims=True)
                p = jnp.exp(s_kv - m)
                inv = pl.reciprocal(jnp.sum(p, axis=-1, keepdims=True),
                                    approx=True)
                a = p * inv
                ctx_h = jnp.dot(a, v_h, preferred_element_type=jnp.float32)
                attn_ref[0, h] = a

            ctx_parts.append(ctx_h)

        # One full-width output projection per grid step (K = D on the MXU),
        # single store -> no per-head read-modify-write on the output block.
        ctx = jnp.concatenate(ctx_parts, axis=-1)                       # [tq, D]
        out_ref[0] = jnp.dot(ctx, wo_ref[...],
                             preferred_element_type=jnp.float32
                             ).astype(out_ref.dtype)

    return kernel


# ----------------------------- wrapper ----------------------------------------


def _pick_q_tile(Lq, q_block):
    if Lq <= q_block:
        return Lq
    for cand in (q_block, 256, 128, 64, 32, 16, 8):
        if cand <= q_block and Lq % cand == 0:
            return cand
    return Lq  # fallback: single tile


def multi_head_attn_mem(key, value, query, mask, params, head_num, memory_num,
                        q_block=512):
    """Pallas implementation of MultiHeadAttnMemLayer.forward (dropout=0).

    Returns (out, attn_vec, attn_mem) matching the PyTorch module.
    """
    B, Lk, D = key.shape
    _, Lq, _ = query.shape
    assert value.shape == (B, Lk, D) and query.shape == (B, Lq, D)
    assert D % head_num == 0
    dh = D // head_num
    scale = 1.0 / math.sqrt(dh)

    # Transposed weights so the kernel computes x @ W.T as a plain matmul.
    wq_t = params["wq"].T
    wk_t = params["wk"].T
    wv_t = params["wv"].T
    wo_t = params["wo"].T

    # Additive mask bias: 0 where attendable, -1e30 where masked.  Finite, so a
    # fully-masked query row cannot produce NaNs; compare+select is precomputed.
    if mask is None:
        bias = jnp.zeros((B, Lq, Lk), jnp.float32)
    else:
        assert mask.shape == (B, Lq, Lk)
        bias = jnp.where(mask.astype(jnp.bool_),
                         jnp.float32(-1e30), jnp.float32(0.0))

    tq = _pick_q_tile(Lq, q_block)      # bounds VMEM on v7x (64 MiB) for long Lq
    n_q = Lq // tq
    Ltot = Lk + memory_num

    in_specs = [
        pl.BlockSpec((1, tq, D), lambda b, qi: (b, qi, 0)),    # query tile
        pl.BlockSpec((1, Lk, D), lambda b, qi: (b, 0, 0)),     # key   (resident across q tiles)
        pl.BlockSpec((1, Lk, D), lambda b, qi: (b, 0, 0)),     # value (resident across q tiles)
        pl.BlockSpec((1, tq, Lk), lambda b, qi: (b, qi, 0)),   # additive mask bias
        pl.BlockSpec((D, D), lambda b, qi: (0, 0)),            # Wq^T  (resident whole kernel)
        pl.BlockSpec((D, D), lambda b, qi: (0, 0)),            # Wk^T
        pl.BlockSpec((D, D), lambda b, qi: (0, 0)),            # Wv^T
        pl.BlockSpec((D, D), lambda b, qi: (0, 0)),            # Wo^T
    ]
    args = [query, key, value, bias, wq_t, wk_t, wv_t, wo_t]

    if memory_num > 0:
        mem_spec = pl.BlockSpec((head_num, memory_num, dh),
                                lambda b, qi: (0, 0, 0))       # resident
        in_specs += [mem_spec, mem_spec]
        args += [params["key_memory"], params["value_memory"]]

    out_specs = (
        pl.BlockSpec((1, tq, D), lambda b, qi: (b, qi, 0)),
        pl.BlockSpec((1, head_num, tq, Ltot), lambda b, qi: (b, 0, qi, 0)),
    )
    out_shape = (
        jax.ShapeDtypeStruct((B, Lq, D), jnp.float32),
        jax.ShapeDtypeStruct((B, head_num, Lq, Ltot), jnp.float32),
    )

    kernel = _make_kernel(scale, head_num, dh, memory_num)

    out, attn_all = pl.pallas_call(
        kernel,
        grid=(B, n_q),
        in_specs=in_specs,
        out_specs=out_specs,
        out_shape=out_shape,
        scratch_shapes=[pltpu.VMEM((Lk, D), jnp.float32),   # K_up (per batch elem)
                        pltpu.VMEM((Lk, D), jnp.float32)],  # V_up
        compiler_params=pltpu.CompilerParams(
            # batch is megacore-parallel; q-tile axis must stay serial because
            # K_up/V_up scratch is initialised at qi == 0.
            dimension_semantics=("parallel", "arbitrary"),
            vmem_limit_bytes=64 * 1024 * 1024),
    )(*args)

    attn_vec = attn_all[..., :Lk]
    attn_mem = attn_all[..., Lk:] if memory_num > 0 else None
    return out, attn_vec, attn_mem


# ----------------------------- pure-JAX reference -----------------------------


def reference(key, value, query, mask, params, head_num, memory_num):
    B, Lk, D = key.shape
    _, Lq, _ = query.shape
    dh = D // head_num

    def shape_proj(x):
        b, l, _ = x.shape
        return x.reshape(b, l, head_num, dh).transpose(0, 2, 1, 3)  # [B,H,L,dh]

    k_up = shape_proj(key @ params["wk"].T)
    v_up = shape_proj(value @ params["wv"].T)
    q_up = shape_proj(query @ params["wq"].T)

    if memory_num > 0:
        kmem = jnp.broadcast_to(params["key_memory"][None],
                                (B, head_num, memory_num, dh))
        vmem = jnp.broadcast_to(params["value_memory"][None],
                                (B, head_num, memory_num, dh))
        k_up = jnp.concatenate([k_up, kmem], axis=2)
        v_up = jnp.concatenate([v_up, vmem], axis=2)

    score = jnp.einsum("bhqd,bhkd->bhqk", q_up, k_up) / math.sqrt(dh)
    if mask is not None:
        m = mask
        if memory_num > 0:
            m = jnp.concatenate(
                [m, jnp.zeros((B, Lq, memory_num), dtype=bool)], axis=2)
        score = jnp.where(m[:, None], -jnp.inf, score)
    attn = jax.nn.softmax(score, axis=-1)
    ctx = jnp.einsum("bhqk,bhkd->bhqd", attn, v_up)
    ctx = ctx.transpose(0, 2, 1, 3).reshape(B, Lq, D)
    out = ctx @ params["wo"].T
    if memory_num > 0:
        return out, attn[..., :Lk], attn[..., Lk:]
    return out, attn, None


# ----------------------------- demo --------------------------------------------


if __name__ == "__main__":
    B, L, D, H, M = 2, 8, 32, 4, 4
    dh = D // H

    root = jax.random.PRNGKey(0)
    ks = jax.random.split(root, 10)

    def xavier(k, shape, fan_in, fan_out):
        bound = math.sqrt(6.0 / (fan_in + fan_out))
        return jax.random.uniform(k, shape, jnp.float32, -bound, bound)

    params = {
        "wq": xavier(ks[0], (D, D), D, D),
        "wk": xavier(ks[1], (D, D), D, D),
        "wv": xavier(ks[2], (D, D), D, D),
        "wo": xavier(ks[3], (D, D), D, D),
        "key_memory": xavier(ks[4], (H, M, dh), M * dh, H * dh),
        "value_memory": xavier(ks[5], (H, M, dh), M * dh, H * dh),
    }

    key_in = jax.random.normal(ks[6], (B, L, D), jnp.float32)
    value_in = jax.random.normal(ks[7], (B, L, D), jnp.float32)
    query_in = jax.random.normal(ks[8], (B, L, D), jnp.float32)
    mask = jax.random.uniform(ks[9], (B, L, L)) < 0.2
    mask = mask.at[:, :, 0].set(False)  # keep at least one attendable key per row

    out, attn_vec, attn_mem = multi_head_attn_mem(
        key_in, value_in, query_in, mask, params, H, M)
    jax.block_until_ready((out, attn_vec, attn_mem))

    ref_out, ref_vec, ref_mem = reference(
        key_in, value_in, query_in, mask, params, H, M)

    # Tolerances account for the EUP approximate reciprocal in the softmax.
    assert jnp.allclose(out, ref_out, atol=2e-2, rtol=2e-2), "out mismatch"
    assert jnp.allclose(attn_vec, ref_vec, atol=2e-3, rtol=2e-2), "attn_vec mismatch"
    assert jnp.allclose(attn_mem, ref_mem, atol=2e-3, rtol=2e-2), "attn_mem mismatch"

    print("KERNEL_OK")
</pallas_src>

<mosaic_0001>
module attributes {stable_mosaic.version = 11 : i64} {
  func.func @kernel(%arg0: i32, %arg1: i32, %arg2: memref<1x8x32xf32, #tpu.memory_space<vmem>>, %arg3: memref<1x8x32xf32, #tpu.memory_space<vmem>>, %arg4: memref<1x8x32xf32, #tpu.memory_space<vmem>>, %arg5: memref<1x8x8xf32, #tpu.memory_space<vmem>>, %arg6: memref<32x32xf32, #tpu.memory_space<vmem>>, %arg7: memref<32x32xf32, #tpu.memory_space<vmem>>, %arg8: memref<32x32xf32, #tpu.memory_space<vmem>>, %arg9: memref<32x32xf32, #tpu.memory_space<vmem>>, %arg10: memref<4x4x8xf32, #tpu.memory_space<vmem>>, %arg11: memref<4x4x8xf32, #tpu.memory_space<vmem>>, %arg12: memref<1x8x32xf32, #tpu.memory_space<vmem>>, %arg13: memref<1x4x8x12xf32, #tpu.memory_space<vmem>>, %arg14: memref<8x32xf32, #tpu.memory_space<vmem>>, %arg15: memref<8x32xf32, #tpu.memory_space<vmem>>) attributes {dimension_semantics = [#tpu.dimension_semantics<parallel>, #tpu.dimension_semantics<arbitrary>], iteration_bounds = array<i64: 2, 1>, scalar_prefetch = 0 : i64, scratch_operands = 2 : i64, tpu.core_type = #tpu.core_type<tc>, window_params = [{transform_indices = @transform_0, window_bounds = array<i64: 1, 8, 32>}, {transform_indices = @transform_1, window_bounds = array<i64: 1, 8, 32>}, {transform_indices = @transform_2, window_bounds = array<i64: 1, 8, 32>}, {transform_indices = @transform_3, window_bounds = array<i64: 1, 8, 8>}, {pipeline_mode = #tpu.pipeline_mode<synchronous>, transform_indices = @transform_4, window_bounds = array<i64: 32, 32>}, {pipeline_mode = #tpu.pipeline_mode<synchronous>, transform_indices = @transform_5, window_bounds = array<i64: 32, 32>}, {pipeline_mode = #tpu.pipeline_mode<synchronous>, transform_indices = @transform_6, window_bounds = array<i64: 32, 32>}, {pipeline_mode = #tpu.pipeline_mode<synchronous>, transform_indices = @transform_7, window_bounds = array<i64: 32, 32>}, {pipeline_mode = #tpu.pipeline_mode<synchronous>, transform_indices = @transform_8, window_bounds = array<i64: 4, 4, 8>}, {pipeline_mode = #tpu.pipeline_mode<synchronous>, transform_indices = @transform_9, window_bounds = array<i64: 4, 4, 8>}, {transform_indices = @transform_10, window_bounds = array<i64: 1, 8, 32>}, {transform_indices = @transform_11, window_bounds = array<i64: 1, 4, 8, 12>}]} {
    %c0_i32 = arith.constant 0 : i32
    %0 = arith.cmpi eq, %arg1, %c0_i32 : i32
    %1 = arith.extui %0 : i1 to i32
    %c0_i32_0 = arith.constant 0 : i32
    %2 = arith.cmpi ne, %1, %c0_i32_0 : i32
    scf.if %2 {
      %c0_88 = arith.constant 0 : index
      %c0_89 = arith.constant 0 : index
      %c0_90 = arith.constant 0 : index
      %171 = vector.load %arg3[%c0_88, %c0_89, %c0_90] : memref<1x8x32xf32, #tpu.memory_space<vmem>>, vector<1x8x32xf32>
      %172 = vector.shape_cast %171 : vector<1x8x32xf32> to vector<8x32xf32>
      %c0_91 = arith.constant 0 : index
      %c0_92 = arith.constant 0 : index
      %173 = vector.load %arg7[%c0_91, %c0_92] : memref<32x32xf32, #tpu.memory_space<vmem>>, vector<32x32xf32>
      %cst_93 = arith.constant dense<0.000000e+00> : vector<8x32xf32>
      %174 = tpu.matmul %172, %173, %cst_93 {dimension_numbers = #tpu.dot_dimension_numbers<[1], [0], [0], [1], [0, 0, 1, 1], [], []>} : vector<8x32xf32>, vector<32x32xf32>, vector<8x32xf32> -> vector<8x32xf32>
      %c0_94 = arith.constant 0 : index
      %c0_95 = arith.constant 0 : index
      %175 = vector.load %arg14[%c0_94, %c0_95] : memref<8x32xf32, #tpu.memory_space<vmem>>, vector<8x32xf32>
      tpu.vector_store %arg14[%c0_94, %c0_95], %174 {strides = array<i32>} : memref<8x32xf32, #tpu.memory_space<vmem>>, vector<8x32xf32>,
      %c0_96 = arith.constant 0 : index
      %c0_97 = arith.constant 0 : index
      %c0_98 = arith.constant 0 : index
      %176 = vector.load %arg4[%c0_96, %c0_97, %c0_98] : memref<1x8x32xf32, #tpu.memory_space<vmem>>, vector<1x8x32xf32>
      %177 = vector.shape_cast %176 : vector<1x8x32xf32> to vector<8x32xf32>
      %c0_99 = arith.constant 0 : index
      %c0_100 = arith.constant 0 : index
      %178 = vector.load %arg8[%c0_99, %c0_100] : memref<32x32xf32, #tpu.memory_space<vmem>>, vector<32x32xf32>
      %cst_101 = arith.constant dense<0.000000e+00> : vector<8x32xf32>
      %179 = tpu.matmul %177, %178, %cst_101 {dimension_numbers = #tpu.dot_dimension_numbers<[1], [0], [0], [1], [0, 0, 1, 1], [], []>} : vector<8x32xf32>, vector<32x32xf32>, vector<8x32xf32> -> vector<8x32xf32>
      %c0_102 = arith.constant 0 : index
      %c0_103 = arith.constant 0 : index
      %180 = vector.load %arg15[%c0_102, %c0_103] : memref<8x32xf32, #tpu.memory_space<vmem>>, vector<8x32xf32>
      tpu.vector_store %arg15[%c0_102, %c0_103], %179 {strides = array<i32>} : memref<8x32xf32, #tpu.memory_space<vmem>>, vector<8x32xf32>,
    } else {
    }
    %c0 = arith.constant 0 : index
    %c0_1 = arith.constant 0 : index
    %c0_2 = arith.constant 0 : index
    %3 = vector.load %arg2[%c0, %c0_1, %c0_2] : memref<1x8x32xf32, #tpu.memory_space<vmem>>, vector<1x8x32xf32>
    %4 = vector.shape_cast %3 : vector<1x8x32xf32> to vector<8x32xf32>
    %c0_3 = arith.constant 0 : index
    %c0_4 = arith.constant 0 : index
    %5 = vector.load %arg6[%c0_3, %c0_4] : memref<32x32xf32, #tpu.memory_space<vmem>>, vector<32x32xf32>
    %cst = arith.constant dense<0.000000e+00> : vector<8x32xf32>
    %6 = tpu.matmul %4, %5, %cst {dimension_numbers = #tpu.dot_dimension_numbers<[1], [0], [0], [1], [0, 0, 1, 1], [], []>} : vector<8x32xf32>, vector<32x32xf32>, vector<8x32xf32> -> vector<8x32xf32>
    %cst_5 = arith.constant 0.353553385 : f32
    %7 = vector.broadcast %cst_5 : f32 to vector<8x32xf32>
    %8 = arith.mulf %6, %7 : vector<8x32xf32>
    %c0_6 = arith.constant 0 : index
    %c0_7 = arith.constant 0 : index
    %9 = vector.load %arg14[%c0_6, %c0_7] : memref<8x32xf32, #tpu.memory_space<vmem>>, vector<8x32xf32>
    %c0_8 = arith.constant 0 : index
    %c0_9 = arith.constant 0 : index
    %10 = vector.load %arg15[%c0_8, %c0_9] : memref<8x32xf32, #tpu.memory_space<vmem>>, vector<8x32xf32>
    %c0_10 = arith.constant 0 : index
    %c0_11 = arith.constant 0 : index
    %c0_12 = arith.constant 0 : index
    %11 = vector.load %arg5[%c0_10, %c0_11, %c0_12] : memref<1x8x8xf32, #tpu.memory_space<vmem>>, vector<1x8x8xf32>
    %12 = vector.shape_cast %11 : vector<1x8x8xf32> to vector<8x8xf32>
    %13 = vector.extract_strided_slice %8 {offsets = [0, 0], sizes = [8, 8], strides = [1, 1]} : vector<8x32xf32> to vector<8x8xf32>
    %14 = vector.extract_strided_slice %9 {offsets = [0, 0], sizes = [8, 8], strides = [1, 1]} : vector<8x32xf32> to vector<8x8xf32>
    %15 = vector.extract_strided_slice %10 {offsets = [0, 0], sizes = [8, 8], strides = [1, 1]} : vector<8x32xf32> to vector<8x8xf32>
    %cst_13 = arith.constant dense<0.000000e+00> : vector<8x8xf32>
    %16 = tpu.matmul %13, %14, %cst_13 {dimension_numbers = #tpu.dot_dimension_numbers<[1], [1], [0], [0], [0, 0, 1, 0], [], []>} : vector<8x8xf32>, vector<8x8xf32>, vector<8x8xf32> -> vector<8x8xf32>
    %17 = arith.addf %16, %12 : vector<8x8xf32>
    %c0_14 = arith.constant 0 : index
    %c0_15 = arith.constant 0 : index
    %c0_16 = arith.constant 0 : index
    %18 = vector.load %arg10[%c0_14, %c0_15, %c0_16] : memref<4x4x8xf32, #tpu.memory_space<vmem>>, vector<1x4x8xf32>
    %19 = vector.shape_cast %18 : vector<1x4x8xf32> to vector<4x8xf32>
    %cst_17 = arith.constant dense<0.000000e+00> : vector<8x4xf32>
    %20 = tpu.matmul %13, %19, %cst_17 {dimension_numbers = #tpu.dot_dimension_numbers<[1], [1], [0], [0], [0, 0, 1, 0], [], []>} : vector<8x8xf32>, vector<4x8xf32>, vector<8x4xf32> -> vector<8x4xf32>
    %cst_18 = arith.constant dense<0xFF800000> : vector<8xf32>
    %21 = vector.multi_reduction <maximumf>, %17, %cst_18 [1] : vector<8x8xf32> to vector<8xf32>
    %22 = vector.shape_cast %21 : vector<8xf32> to vector<8x1xf32>
    %cst_19 = arith.constant dense<0xFF800000> : vector<8xf32>
    %23 = vector.multi_reduction <maximumf>, %20, %cst_19 [1] : vector<8x4xf32> to vector<8xf32>
    %24 = vector.shape_cast %23 : vector<8xf32> to vector<8x1xf32>
    %25 = arith.maximumf %22, %24 : vector<8x1xf32>
    %26 = vector.broadcast %25 : vector<8x1xf32> to vector<8x8xf32>
    %27 = arith.subf %17, %26 : vector<8x8xf32>
    %28 = math.exp %27 : vector<8x8xf32>
    %29 = vector.broadcast %25 : vector<8x1xf32> to vector<8x4xf32>
    %30 = arith.subf %20, %29 : vector<8x4xf32>
    %31 = math.exp %30 : vector<8x4xf32>
    %cst_20 = arith.constant dense<0.000000e+00> : vector<8xf32>
    %32 = vector.multi_reduction <add>, %28, %cst_20 [1] : vector<8x8xf32> to vector<8xf32>
    %33 = vector.shape_cast %32 : vector<8xf32> to vector<8x1xf32>
    %cst_21 = arith.constant dense<0.000000e+00> : vector<8xf32>
    %34 = vector.multi_reduction <add>, %31, %cst_21 [1] : vector<8x4xf32> to vector<8xf32>
    %35 = vector.shape_cast %34 : vector<8xf32> to vector<8x1xf32>
    %36 = arith.addf %33, %35 : vector<8x1xf32>
    %37 = tpu.reciprocal %36 {approx = true} : vector<8x1xf32> -> vector<8x1xf32>
    %38 = vector.broadcast %37 : vector<8x1xf32> to vector<8x8xf32>
    %39 = arith.mulf %28, %38 : vector<8x8xf32>
    %40 = vector.broadcast %37 : vector<8x1xf32> to vector<8x4xf32>
    %41 = arith.mulf %31, %40 : vector<8x4xf32>
    %cst_22 = arith.constant dense<0.000000e+00> : vector<8x8xf32>
    %42 = tpu.matmul %39, %15, %cst_22 {dimension_numbers = #tpu.dot_dimension_numbers<[1], [0], [0], [1], [0, 0, 1, 1], [], []>} : vector<8x8xf32>, vector<8x8xf32>, vector<8x8xf32> -> vector<8x8xf32>
    %c0_23 = arith.constant 0 : index
    %c0_24 = arith.constant 0 : index
    %c0_25 = arith.constant 0 : index
    %43 = vector.load %arg11[%c0_23, %c0_24, %c0_25] : memref<4x4x8xf32, #tpu.memory_space<vmem>>, vector<1x4x8xf32>
    %44 = vector.shape_cast %43 : vector<1x4x8xf32> to vector<4x8xf32>
    %cst_26 = arith.constant dense<0.000000e+00> : vector<8x8xf32>
    %45 = tpu.matmul %41, %44, %cst_26 {dimension_numbers = #tpu.dot_dimension_numbers<[1], [0], [0], [1], [0, 0, 1, 1], [], []>} : vector<8x4xf32>, vector<4x8xf32>, vector<8x8xf32> -> vector<8x8xf32>
    %46 = arith.addf %42, %45 : vector<8x8xf32>
    %47 = tpu.concatenate %39, %41 in 1 : vector<8x8xf32>, vector<8x4xf32> -> vector<8x12xf32>
    %c0_27 = arith.constant 0 : index
    %c0_28 = arith.constant 0 : index
    %c0_29 = arith.constant 0 : index
    %c0_30 = arith.constant 0 : index
    %48 = vector.load %arg13[%c0_27, %c0_28, %c0_29, %c0_30] : memref<1x4x8x12xf32, #tpu.memory_space<vmem>>, vector<1x1x8x12xf32>
    %49 = vector.shape_cast %48 : vector<1x1x8x12xf32> to vector<8x12xf32>
    %50 = vector.shape_cast %47 : vector<8x12xf32> to vector<1x1x8x12xf32>
    tpu.vector_store %arg13[%c0_27, %c0_28, %c0_29, %c0_30], %50 {strides = array<i32>} : memref<1x4x8x12xf32, #tpu.memory_space<vmem>>, vector<1x1x8x12xf32>,
    %51 = vector.extract_strided_slice %8 {offsets = [0, 8], sizes = [8, 8], strides = [1, 1]} : vector<8x32xf32> to vector<8x8xf32>
    %52 = vector.extract_strided_slice %9 {offsets = [0, 8], sizes = [8, 8], strides = [1, 1]} : vector<8x32xf32> to vector<8x8xf32>
    %53 = vector.extract_strided_slice %10 {offsets = [0, 8], sizes = [8, 8], strides = [1, 1]} : vector<8x32xf32> to vector<8x8xf32>
    %cst_31 = arith.constant dense<0.000000e+00> : vector<8x8xf32>
    %54 = tpu.matmul %51, %52, %cst_31 {dimension_numbers = #tpu.dot_dimension_numbers<[1], [1], [0], [0], [0, 0, 1, 0], [], []>} : vector<8x8xf32>, vector<8x8xf32>, vector<8x8xf32> -> vector<8x8xf32>
    %55 = arith.addf %54, %12 : vector<8x8xf32>
    %c1 = arith.constant 1 : index
    %c0_32 = arith.constant 0 : index
    %c0_33 = arith.constant 0 : index
    %56 = vector.load %arg10[%c1, %c0_32, %c0_33] : memref<4x4x8xf32, #tpu.memory_space<vmem>>, vector<1x4x8xf32>
    %57 = vector.shape_cast %56 : vector<1x4x8xf32> to vector<4x8xf32>
    %cst_34 = arith.constant dense<0.000000e+00> : vector<8x4xf32>
    %58 = tpu.matmul %51, %57, %cst_34 {dimension_numbers = #tpu.dot_dimension_numbers<[1], [1], [0], [0], [0, 0, 1, 0], [], []>} : vector<8x8xf32>, vector<4x8xf32>, vector<8x4xf32> -> vector<8x4xf32>
    %cst_35 = arith.constant dense<0xFF800000> : vector<8xf32>
    %59 = vector.multi_reduction <maximumf>, %55, %cst_35 [1] : vector<8x8xf32> to vector<8xf32>
    %60 = vector.shape_cast %59 : vector<8xf32> to vector<8x1xf32>
    %cst_36 = arith.constant dense<0xFF800000> : vector<8xf32>
    %61 = vector.multi_reduction <maximumf>, %58, %cst_36 [1] : vector<8x4xf32> to vector<8xf32>
    %62 = vector.shape_cast %61 : vector<8xf32> to vector<8x1xf32>
    %63 = arith.maximumf %60, %62 : vector<8x1xf32>
    %64 = vector.broadcast %63 : vector<8x1xf32> to vector<8x8xf32>
    %65 = arith.subf %55, %64 : vector<8x8xf32>
    %66 = math.exp %65 : vector<8x8xf32>
    %67 = vector.broadcast %63 : vector<8x1xf32> to vector<8x4xf32>
    %68 = arith.subf %58, %67 : vector<8x4xf32>
    %69 = math.exp %68 : vector<8x4xf32>
    %cst_37 = arith.constant dense<0.000000e+00> : vector<8xf32>
    %70 = vector.multi_reduction <add>, %66, %cst_37 [1] : vector<8x8xf32> to vector<8xf32>
    %71 = vector.shape_cast %70 : vector<8xf32> to vector<8x1xf32>
    %cst_38 = arith.constant dense<0.000000e+00> : vector<8xf32>
    %72 = vector.multi_reduction <add>, %69, %cst_38 [1] : vector<8x4xf32> to vector<8xf32>
    %73 = vector.shape_cast %72 : vector<8xf32> to vector<8x1xf32>
    %74 = arith.addf %71, %73 : vector<8x1xf32>
    %75 = tpu.reciprocal %74 {approx = true} : vector<8x1xf32> -> vector<8x1xf32>
    %76 = vector.broadcast %75 : vector<8x1xf32> to vector<8x8xf32>
    %77 = arith.mulf %66, %76 : vector<8x8xf32>
    %78 = vector.broadcast %75 : vector<8x1xf32> to vector<8x4xf32>
    %79 = arith.mulf %69, %78 : vector<8x4xf32>
    %cst_39 = arith.constant dense<0.000000e+00> : vector<8x8xf32>
    %80 = tpu.matmul %77, %53, %cst_39 {dimension_numbers = #tpu.dot_dimension_numbers<[1], [0], [0], [1], [0, 0, 1, 1], [], []>} : vector<8x8xf32>, vector<8x8xf32>, vector<8x8xf32> -> vector<8x8xf32>
    %c1_40 = arith.constant 1 : index
    %c0_41 = arith.constant 0 : index
    %c0_42 = arith.constant 0 : index
    %81 = vector.load %arg11[%c1_40, %c0_41, %c0_42] : memref<4x4x8xf32, #tpu.memory_space<vmem>>, vector<1x4x8xf32>
    %82 = vector.shape_cast %81 : vector<1x4x8xf32> to vector<4x8xf32>
    %cst_43 = arith.constant dense<0.000000e+00> : vector<8x8xf32>
    %83 = tpu.matmul %79, %82, %cst_43 {dimension_numbers = #tpu.dot_dimension_numbers<[1], [0], [0], [1], [0, 0, 1, 1], [], []>} : vector<8x4xf32>, vector<4x8xf32>, vector<8x8xf32> -> vector<8x8xf32>
    %84 = arith.addf %80, %83 : vector<8x8xf32>
    %85 = tpu.concatenate %77, %79 in 1 : vector<8x8xf32>, vector<8x4xf32> -> vector<8x12xf32>
    %c0_44 = arith.constant 0 : index
    %c1_45 = arith.constant 1 : index
    %c0_46 = arith.constant 0 : index
    %c0_47 = arith.constant 0 : index
    %86 = vector.load %arg13[%c0_44, %c1_45, %c0_46, %c0_47] : memref<1x4x8x12xf32, #tpu.memory_space<vmem>>, vector<1x1x8x12xf32>
    %87 = vector.shape_cast %86 : vector<1x1x8x12xf32> to vector<8x12xf32>
    %88 = vector.shape_cast %85 : vector<8x12xf32> to vector<1x1x8x12xf32>
    tpu.vector_store %arg13[%c0_44, %c1_45, %c0_46, %c0_47], %88 {strides = array<i32>} : memref<1x4x8x12xf32, #tpu.memory_space<vmem>>, vector<1x1x8x12xf32>,
    %89 = vector.extract_strided_slice %8 {offsets = [0, 16], sizes = [8, 8], strides = [1, 1]} : vector<8x32xf32> to vector<8x8xf32>
    %90 = vector.extract_strided_slice %9 {offsets = [0, 16], sizes = [8, 8], strides = [1, 1]} : vector<8x32xf32> to vector<8x8xf32>
    %91 = vector.extract_strided_slice %10 {offsets = [0, 16], sizes = [8, 8], strides = [1, 1]} : vector<8x32xf32> to vector<8x8xf32>
    %cst_48 = arith.constant dense<0.000000e+00> : vector<8x8xf32>
    %92 = tpu.matmul %89, %90, %cst_48 {dimension_numbers = #tpu.dot_dimension_numbers<[1], [1], [0], [0], [0, 0, 1, 0], [], []>} : vector<8x8xf32>, vector<8x8xf32>, vector<8x8xf32> -> vector<8x8xf32>
    %93 = arith.addf %92, %12 : vector<8x8xf32>
    %c2 = arith.constant 2 : index
    %c0_49 = arith.constant 0 : index
    %c0_50 = arith.constant 0 : index
    %94 = vector.load %arg10[%c2, %c0_49, %c0_50] : memref<4x4x8xf32, #tpu.memory_space<vmem>>, vector<1x4x8xf32>
    %95 = vector.shape_cast %94 : vector<1x4x8xf32> to vector<4x8xf32>
    %cst_51 = arith.constant dense<0.000000e+00> : vector<8x4xf32>
    %96 = tpu.matmul %89, %95, %cst_51 {dimension_numbers = #tpu.dot_dimension_numbers<[1], [1], [0], [0], [0, 0, 1, 0], [], []>} : vector<8x8xf32>, vector<4x8xf32>, vector<8x4xf32> -> vector<8x4xf32>
    %cst_52 = arith.constant dense<0xFF800000> : vector<8xf32>
    %97 = vector.multi_reduction <maximumf>, %93, %cst_52 [1] : vector<8x8xf32> to vector<8xf32>
    %98 = vector.shape_cast %97 : vector<8xf32> to vector<8x1xf32>
    %cst_53 = arith.constant dense<0xFF800000> : vector<8xf32>
    %99 = vector.multi_reduction <maximumf>, %96, %cst_53 [1] : vector<8x4xf32> to vector<8xf32>
    %100 = vector.shape_cast %99 : vector<8xf32> to vector<8x1xf32>
    %101 = arith.maximumf %98, %100 : vector<8x1xf32>
    %102 = vector.broadcast %101 : vector<8x1xf32> to vector<8x8xf32>
    %103 = arith.subf %93, %102 : vector<8x8xf32>
    %104 = math.exp %103 : vector<8x8xf32>
    %105 = vector.broadcast %101 : vector<8x1xf32> to vector<8x4xf32>
    %106 = arith.subf %96, %105 : vector<8x4xf32>
    %107 = math.exp %106 : vector<8x4xf32>
    %cst_54 = arith.constant dense<0.000000e+00> : vector<8xf32>
    %108 = vector.multi_reduction <add>, %104, %cst_54 [1] : vector<8x8xf32> to vector<8xf32>
    %109 = vector.shape_cast %108 : vector<8xf32> to vector<8x1xf32>
    %cst_55 = arith.constant dense<0.000000e+00> : vector<8xf32>
    %110 = vector.multi_reduction <add>, %107, %cst_55 [1] : vector<8x4xf32> to vector<8xf32>
    %111 = vector.shape_cast %110 : vector<8xf32> to vector<8x1xf32>
    %112 = arith.addf %109, %111 : vector<8x1xf32>
    %113 = tpu.reciprocal %112 {approx = true} : vector<8x1xf32> -> vector<8x1xf32>
    %114 = vector.broadcast %113 : vector<8x1xf32> to vector<8x8xf32>
    %115 = arith.mulf %104, %114 : vector<8x8xf32>
    %116 = vector.broadcast %113 : vector<8x1xf32> to vector<8x4xf32>
    %117 = arith.mulf %107, %116 : vector<8x4xf32>
    %cst_56 = arith.constant dense<0.000000e+00> : vector<8x8xf32>
    %118 = tpu.matmul %115, %91, %cst_56 {dimension_numbers = #tpu.dot_dimension_numbers<[1], [0], [0], [1], [0, 0, 1, 1], [], []>} : vector<8x8xf32>, vector<8x8xf32>, vector<8x8xf32> -> vector<8x8xf32>
    %c2_57 = arith.constant 2 : index
    %c0_58 = arith.constant 0 : index
    %c0_59 = arith.constant 0 : index
    %119 = vector.load %arg11[%c2_57, %c0_58, %c0_59] : memref<4x4x8xf32, #tpu.memory_space<vmem>>, vector<1x4x8xf32>
    %120 = vector.shape_cast %119 : vector<1x4x8xf32> to vector<4x8xf32>
    %cst_60 = arith.constant dense<0.000000e+00> : vector<8x8xf32>
    %121 = tpu.matmul %117, %120, %cst_60 {dimension_numbers = #tpu.dot_dimension_numbers<[1], [0], [0], [1], [0, 0, 1, 1], [], []>} : vector<8x4xf32>, vector<4x8xf32>, vector<8x8xf32> -> vector<8x8xf32>
    %122 = arith.addf %118, %121 : vector<8x8xf32>
    %123 = tpu.concatenate %115, %117 in 1 : vector<8x8xf32>, vector<8x4xf32> -> vector<8x12xf32>
    %c0_61 = arith.constant 0 : index
    %c2_62 = arith.constant 2 : index
    %c0_63 = arith.constant 0 : index
    %c0_64 = arith.constant 0 : index
    %124 = vector.load %arg13[%c0_61, %c2_62, %c0_63, %c0_64] : memref<1x4x8x12xf32, #tpu.memory_space<vmem>>, vector<1x1x8x12xf32>
    %125 = vector.shape_cast %124 : vector<1x1x8x12xf32> to vector<8x12xf32>
    %126 = vector.shape_cast %123 : vector<8x12xf32> to vector<1x1x8x12xf32>
    tpu.vector_store %arg13[%c0_61, %c2_62, %c0_63, %c0_64], %126 {strides = array<i32>} : memref<1x4x8x12xf32, #tpu.memory_space<vmem>>, vector<1x1x8x12xf32>,
    %127 = vector.extract_strided_slice %8 {offsets = [0, 24], sizes = [8, 8], strides = [1, 1]} : vector<8x32xf32> to vector<8x8xf32>
    %128 = vector.extract_strided_slice %9 {offsets = [0, 24], sizes = [8, 8], strides = [1, 1]} : vector<8x32xf32> to vector<8x8xf32>
    %129 = vector.extract_strided_slice %10 {offsets = [0, 24], sizes = [8, 8], strides = [1, 1]} : vector<8x32xf32> to vector<8x8xf32>
    %cst_65 = arith.constant dense<0.000000e+00> : vector<8x8xf32>
    %130 = tpu.matmul %127, %128, %cst_65 {dimension_numbers = #tpu.dot_dimension_numbers<[1], [1], [0], [0], [0, 0, 1, 0], [], []>} : vector<8x8xf32>, vector<8x8xf32>, vector<8x8xf32> -> vector<8x8xf32>
    %131 = arith.addf %130, %12 : vector<8x8xf32>
    %c3 = arith.constant 3 : index
    %c0_66 = arith.constant 0 : index
    %c0_67 = arith.constant 0 : index
    %132 = vector.load %arg10[%c3, %c0_66, %c0_67] : memref<4x4x8xf32, #tpu.memory_space<vmem>>, vector<1x4x8xf32>
    %133 = vector.shape_cast %132 : vector<1x4x8xf32> to vector<4x8xf32>
    %cst_68 = arith.constant dense<0.000000e+00> : vector<8x4xf32>
    %134 = tpu.matmul %127, %133, %cst_68 {dimension_numbers = #tpu.dot_dimension_numbers<[1], [1], [0], [0], [0, 0, 1, 0], [], []>} : vector<8x8xf32>, vector<4x8xf32>, vector<8x4xf32> -> vector<8x4xf32>
    %cst_69 = arith.constant dense<0xFF800000> : vector<8xf32>
    %135 = vector.multi_reduction <maximumf>, %131, %cst_69 [1] : vector<8x8xf32> to vector<8xf32>
    %136 = vector.shape_cast %135 : vector<8xf32> to vector<8x1xf32>
    %cst_70 = arith.constant dense<0xFF800000> : vector<8xf32>
    %137 = vector.multi_reduction <maximumf>, %134, %cst_70 [1] : vector<8x4xf32> to vector<8xf32>
    %138 = vector.shape_cast %137 : vector<8xf32> to vector<8x1xf32>
    %139 = arith.maximumf %136, %138 : vector<8x1xf32>
    %140 = vector.broadcast %139 : vector<8x1xf32> to vector<8x8xf32>
    %141 = arith.subf %131, %140 : vector<8x8xf32>
    %142 = math.exp %141 : vector<8x8xf32>
    %143 = vector.broadcast %139 : vector<8x1xf32> to vector<8x4xf32>
    %144 = arith.subf %134, %143 : vector<8x4xf32>
    %145 = math.exp %144 : vector<8x4xf32>
    %cst_71 = arith.constant dense<0.000000e+00> : vector<8xf32>
    %146 = vector.multi_reduction <add>, %142, %cst_71 [1] : vector<8x8xf32> to vector<8xf32>
    %147 = vector.shape_cast %146 : vector<8xf32> to vector<8x1xf32>
    %cst_72 = arith.constant dense<0.000000e+00> : vector<8xf32>
    %148 = vector.multi_reduction <add>, %145, %cst_72 [1] : vector<8x4xf32> to vector<8xf32>
    %149 = vector.shape_cast %148 : vector<8xf32> to vector<8x1xf32>
    %150 = arith.addf %147, %149 : vector<8x1xf32>
    %151 = tpu.reciprocal %150 {approx = true} : vector<8x1xf32> -> vector<8x1xf32>
    %152 = vector.broadcast %151 : vector<8x1xf32> to vector<8x8xf32>
    %153 = arith.mulf %142, %152 : vector<8x8xf32>
    %154 = vector.broadcast %151 : vector<8x1xf32> to vector<8x4xf32>
    %155 = arith.mulf %145, %154 : vector<8x4xf32>
    %cst_73 = arith.constant dense<0.000000e+00> : vector<8x8xf32>
    %156 = tpu.matmul %153, %129, %cst_73 {dimension_numbers = #tpu.dot_dimension_numbers<[1], [0], [0], [1], [0, 0, 1, 1], [], []>} : vector<8x8xf32>, vector<8x8xf32>, vector<8x8xf32> -> vector<8x8xf32>
    %c3_74 = arith.constant 3 : index
    %c0_75 = arith.constant 0 : index
    %c0_76 = arith.constant 0 : index
    %157 = vector.load %arg11[%c3_74, %c0_75, %c0_76] : memref<4x4x8xf32, #tpu.memory_space<vmem>>, vector<1x4x8xf32>
    %158 = vector.shape_cast %157 : vector<1x4x8xf32> to vector<4x8xf32>
    %cst_77 = arith.constant dense<0.000000e+00> : vector<8x8xf32>
    %159 = tpu.matmul %155, %158, %cst_77 {dimension_numbers = #tpu.dot_dimension_numbers<[1], [0], [0], [1], [0, 0, 1, 1], [], []>} : vector<8x4xf32>, vector<4x8xf32>, vector<8x8xf32> -> vector<8x8xf32>
    %160 = arith.addf %156, %159 : vector<8x8xf32>
    %161 = tpu.concatenate %153, %155 in 1 : vector<8x8xf32>, vector<8x4xf32> -> vector<8x12xf32>
    %c0_78 = arith.constant 0 : index
    %c3_79 = arith.constant 3 : index
    %c0_80 = arith.constant 0 : index
    %c0_81 = arith.constant 0 : index
    %162 = vector.load %arg13[%c0_78, %c3_79, %c0_80, %c0_81] : memref<1x4x8x12xf32, #tpu.memory_space<vmem>>, vector<1x1x8x12xf32>
    %163 = vector.shape_cast %162 : vector<1x1x8x12xf32> to vector<8x12xf32>
    %164 = vector.shape_cast %161 : vector<8x12xf32> to vector<1x1x8x12xf32>
    tpu.vector_store %arg13[%c0_78, %c3_79, %c0_80, %c0_81], %164 {strides = array<i32>} : memref<1x4x8x12xf32, #tpu.memory_space<vmem>>, vector<1x1x8x12xf32>,
    %165 = tpu.concatenate %46, %84, %122, %160 in 1 : vector<8x8xf32>, vector<8x8xf32>, vector<8x8xf32>, vector<8x8xf32> -> vector<8x32xf32>
    %c0_82 = arith.constant 0 : index
    %c0_83 = arith.constant 0 : index
    %166 = vector.load %arg9[%c0_82, %c0_83] : memref<32x32xf32, #tpu.memory_space<vmem>>, vector<32x32xf32>
    %cst_84 = arith.constant dense<0.000000e+00> : vector<8x32xf32>
    %167 = tpu.matmul %165, %166, %cst_84 {dimension_numbers = #tpu.dot_dimension_numbers<[1], [0], [0], [1], [0, 0, 1, 1], [], []>} : vector<8x32xf32>, vector<32x32xf32>, vector<8x32xf32> -> vector<8x32xf32>
    %c0_85 = arith.constant 0 : index
    %c0_86 = arith.constant 0 : index
    %c0_87 = arith.constant 0 : index
    %168 = vector.load %arg12[%c0_85, %c0_86, %c0_87] : memref<1x8x32xf32, #tpu.memory_space<vmem>>, vector<1x8x32xf32>
    %169 = vector.shape_cast %168 : vector<1x8x32xf32> to vector<8x32xf32>
    %170 = vector.shape_cast %167 : vector<8x32xf32> to vector<1x8x32xf32>
    tpu.vector_store %arg12[%c0_85, %c0_86, %c0_87], %170 {strides = array<i32>} : memref<1x8x32xf32, #tpu.memory_space<vmem>>, vector<1x8x32xf32>,
    return
  }
  func.func @transform_0(%arg0: i32, %arg1: i32) -> (i32, i32, i32) {
    %c0_i32 = arith.constant 0 : i32
    %c0_i32_0 = arith.constant 0 : i32
    return %arg0, %arg1, %c0_i32 : i32, i32, i32
  }
  func.func @transform_1(%arg0: i32, %arg1: i32) -> (i32, i32, i32) {
    %c0_i32 = arith.constant 0 : i32
    %c0_i32_0 = arith.constant 0 : i32
    %c0_i32_1 = arith.constant 0 : i32
    return %arg0, %c0_i32, %c0_i32_0 : i32, i32, i32
  }
  func.func @transform_2(%arg0: i32, %arg1: i32) -> (i32, i32, i32) {
    %c0_i32 = arith.constant 0 : i32
    %c0_i32_0 = arith.constant 0 : i32
    %c0_i32_1 = arith.constant 0 : i32
    return %arg0, %c0_i32, %c0_i32_0 : i32, i32, i32
  }
  func.func @transform_3(%arg0: i32, %arg1: i32) -> (i32, i32, i32) {
    %c0_i32 = arith.constant 0 : i32
    %c0_i32_0 = arith.constant 0 : i32
    return %arg0, %arg1, %c0_i32 : i32, i32, i32
  }
  func.func @transform_4(%arg0: i32, %arg1: i32) -> (i32, i32) {
    %c0_i32 = arith.constant 0 : i32
    %c0_i32_0 = arith.constant 0 : i32
    %c0_i32_1 = arith.constant 0 : i32
    return %c0_i32, %c0_i32_0 : i32, i32
  }
  func.func @transform_5(%arg0: i32, %arg1: i32) -> (i32, i32) {
    %c0_i32 = arith.constant 0 : i32
    %c0_i32_0 = arith.constant 0 : i32
    %c0_i32_1 = arith.constant 0 : i32
    return %c0_i32, %c0_i32_0 : i32, i32
  }
  func.func @transform_6(%arg0: i32, %arg1: i32) -> (i32, i32) {
    %c0_i32 = arith.constant 0 : i32
    %c0_i32_0 = arith.constant 0 : i32
    %c0_i32_1 = arith.constant 0 : i32
    return %c0_i32, %c0_i32_0 : i32, i32
  }
  func.func @transform_7(%arg0: i32, %arg1: i32) -> (i32, i32) {
    %c0_i32 = arith.constant 0 : i32
    %c0_i32_0 = arith.constant 0 : i32
    %c0_i32_1 = arith.constant 0 : i32
    return %c0_i32, %c0_i32_0 : i32, i32
  }
  func.func @transform_8(%arg0: i32, %arg1: i32) -> (i32, i32, i32) {
    %c0_i32 = arith.constant 0 : i32
    %c0_i32_0 = arith.constant 0 : i32
    %c0_i32_1 = arith.constant 0 : i32
    %c0_i32_2 = arith.constant 0 : i32
    return %c0_i32, %c0_i32_0, %c0_i32_1 : i32, i32, i32
  }
  func.func @transform_9(%arg0: i32, %arg1: i32) -> (i32, i32, i32) {
    %c0_i32 = arith.constant 0 : i32
    %c0_i32_0 = arith.constant 0 : i32
    %c0_i32_1 = arith.constant 0 : i32
    %c0_i32_2 = arith.constant 0 : i32
    return %c0_i32, %c0_i32_0, %c0_i32_1 : i32, i32, i32
  }
  func.func @transform_10(%arg0: i32, %arg1: i32) -> (i32, i32, i32) {
    %c0_i32 = arith.constant 0 : i32
    %c0_i32_0 = arith.constant 0 : i32
    return %arg0, %arg1, %c0_i32 : i32, i32, i32
  }
  func.func @transform_11(%arg0: i32, %arg1: i32) -> (i32, i32, i32, i32) {
    %c0_i32 = arith.constant 0 : i32
    %c0_i32_0 = arith.constant 0 : i32
    %c0_i32_1 = arith.constant 0 : i32
    return %arg0, %c0_i32, %arg1, %c0_i32_0 : i32, i32, i32, i32
  }
}

</mosaic_0001>

<bundles_post_ra>
// kernel: tpu_custom_call.1
= control target key start
LH: loop header
LB: loop body
LE: loop exit
PB: predicated region body
PF: predicated region fallthrough
CT: control target
= control target key end

     0   :  { %s2756_s0 = inlined_call_operand.hbm [shape: f32[2,8,32], index: 0, kind: input, shape index: {}]   ;;  %s2757_s1 = inlined_call_operand.hbm [shape: f32[2,8,32], index: 1, kind: input, shape index: {}]   ;;  %s2758_s2 = inlined_call_operand.hbm [shape: f32[2,8,32], index: 2, kind: input, shape index: {}]   ;;  %s2759_s3 = inlined_call_operand.hbm [shape: f32[2,8,8], index: 3, kind: input, shape index: {}]   ;;  %s2760_s4 = inlined_call_operand.hbm [shape: f32[32,32], index: 4, kind: input, shape index: {}]   ;;  %s2761_s5 = inlined_call_operand.hbm [shape: f32[32,32], index: 5, kind: input, shape index: {}]   ;;  %s2762_s6 = inlined_call_operand.hbm [shape: f32[32,32], index: 6, kind: input, shape index: {}]   ;;  %s2763_s7 = inlined_call_operand.hbm [shape: f32[32,32], index: 7, kind: input, shape index: {}]   ;;  %s2764_s8 = inlined_call_operand.hbm [shape: f32[4,4,8], index: 8, kind: input, shape index: {}]   ;;  %s2765_s9 = inlined_call_operand.hbm [shape: f32[4,4,8], index: 9, kind: input, shape index: {}]   ;;  %s2766_s10 = inlined_call_operand.hbm [shape: f32[2,8,32], index: 10, kind: output, shape index: {0}]   ;;  %s2767_s11 = inlined_call_operand.hbm [shape: f32[2,4,8,12], index: 11, kind: output, shape index: {1}]  }
   0x1   :  { %2778 = sst [smem:[#allocation38_spill]] %s2757_s1 }
   0x2   :  { %2779 = sst [smem:[#allocation39_spill]] %s2760_s4 }
   0x3   :  { %2780 = sst [smem:[#allocation40_spill]] %s2761_s5 }
   0x4   :  { %2781 = sst [smem:[#allocation41_spill]] %s2762_s6 }
   0x5   :  { %2782 = sst [smem:[#allocation42_spill]] %s2763_s7 }
   0x6   :  { %2783 = sst [smem:[#allocation43_spill]] %s2764_s8 }
   0x7   :  { %2784 = sst [smem:[#allocation44_spill]] %s2766_s10 }
   0x8   :  { %2785 = sst [smem:[#allocation45_spill]] %s2767_s11 }
   0x9   :  { %17 = vsyncpa [#allocation5], 0 }
   0xa   :  { %19 = vsyncpa [#allocation5 + $0x1], 0 }
   0xb   :  { %20 = vsyncpa [#allocation8], 0 }
   0xc   :  { %22 = vsyncpa [#allocation8 + $0x1], 0 }
   0xd   :  { %23 = vsyncpa [#allocation11], 0 }
   0xe   :  { %25 = vsyncpa [#allocation11 + $0x1], 0 }
   0xf   :  { %26 = vsyncpa [#allocation14], 0 }
  0x10   :  { %27 = vsyncpa [#allocation17], 0 }
  0x11   :  { %28 = vsyncpa [#allocation20], 0 }
  0x12   :  { %29 = vsyncpa [#allocation6], 0 }
  0x13   :  { %31 = vsyncpa [#allocation6 + $0x1], 0 }
  0x14   :  { %32 = vsyncpa [#allocation23], 0 }
  0x15   :  { %34 = vsyncpa [#allocation23 + $0x1], 0  ;;  %s2380_s17 = smov 0   ;;  %s2382_s18 = smov 0  }
  0x16   :  { %s2384_s19 = smov 0   ;;  %s2386_s20 = smov 0  }
  0x17   :  { %s2388_s21 = smov 0   ;;  %s2390_s22 = smov 0  }
  0x18 LB: > { %2786 = sst [smem:[#allocation33_spill]] %s2281_s17  ;;  %s2411_s23 = sadd.s32 4294967295, %s2301_s22   ;;  %s2301_s22 = sphi %s2390_s22, %s40_s22   ;;  %s2297_s21 = sphi %s2388_s21, %s2814_s21   ;;  %s2293_s20 = sphi %s2386_s20, %s2813_s20   ;;  %s2289_s19 = sphi %s2384_s19, %s2817_s19   ;;  %s2285_s18 = sphi %s2382_s18, %s2816_s18   ;;  %s2281_s17 = sphi %s2380_s17, %s2815_s17  }
  0x19   : > { %2787 = sst [smem:[#allocation34_spill]] %s2297_s21  ;;  %p1613_p0 = scmp.ge.s32.totalorder %s2301_s22, 1 }
  0x1a   : > { %p75_p1 = scmp.eq.s32.totalorder %s2411_s23, 0  ;;  %p347_p2 = scmp.lt.s32.totalorder %s2301_s22, 3 }
  0x1b   : > { %s2788_s4 = sld [smem:[#allocation39_spill]]  ;;  %s2303_s28 = smov [#allocation12]  }
  0x1c   : > { %p2419_p3 = pnand %p1613_p0, %p347_p2  ;;  %s360_s29 = sshll.u32 %s2303_s28, 4  ;;  %s361_s29 = int_to_ptr.vmem [resolvable:$true] %s360_s29 }
  0x1d   : > { %p1620_p6 = scmp.ge.s32.totalorder %s2301_s22, 2  ;;  %s2791_s5 = sld [smem:[#allocation40_spill]] }
  0x1e   : > { %p1721_p4 = pneg %p2419_p3  ;;  %s2768_s15 = smov 128  }
  0x1f   : > { %s2769_s16 = smov 8   ;;  %s2306_s24 = smov [#allocation13]  }
  0x20   : > { %p2427_p5 = pnand %p1721_p4, %p75_p1  ;;  %s374_s25 = sshll.u32 %s2306_s24, 4  ;;  %s375_s25 = int_to_ptr.vmem [resolvable:$true] %s374_s25 }
  0x21   : > { %s358_s26 = sshll.u32 %s2788_s4, 4  ;;  %s2792_s7 = sld [smem:[#allocation42_spill]]  ;;  %s359_s26 = int_to_ptr.hbm [resolvable:$true] %s358_s26 }
  0x22   : > { %1724 = dma.hbm_to_vmem [thread:$0]  (!%p2427_p5), %s359_s26, 512, %s361_s29, [#allocation11], %s2768_s15, %s2768_s15, %s2769_s16  }
  0x23   : > { %s372_s14 = sshll.u32 %s2791_s5, 4  ;;  %s2307_s26 = smov [#allocation16]   ;;  %s373_s14 = int_to_ptr.hbm [resolvable:$true] %s372_s14 }
  0x24   : > { %1727 = dma.hbm_to_vmem [thread:$0]  (!%p2427_p5), %s373_s14, 512, %s375_s25, [#allocation14], %s2768_s15, %s2768_s15, %s2769_s16  }
  0x25   : > { %s402_s29 = sshll.u32 %s2307_s26, 4  ;;  %s1612_s24 = sadd.s32 4294967294, %s2301_s22   ;;  %s403_s29 = int_to_ptr.vmem [resolvable:$true] %s402_s29 }
  0x26   : > { %s52_s28 = sadd.s32 1, %s2297_s21  ;;  %s61_s12 = sadd.s32 1, %s2289_s19 }
  0x27   : > { %s400_s13 = sshll.u32 %s2792_s7, 4  ;;  %p54_p7 = scmp.ge.s32.totalorder %s52_s28, 2  ;;  %s401_s13 = int_to_ptr.hbm [resolvable:$true] %s400_s13 }
  0x28   : > { %1733 = dma.hbm_to_vmem [thread:$0]  (!%p2427_p5), %s401_s13, 512, %s403_s29, [#allocation17], %s2768_s15, %s2768_s15, %s2769_s16  }
  0x29   : > { %p68_p8 = scmp.ne.s32.totalorder %s2289_s19, %s2285_s18  ;;  %p69_p9 = scmp.eq.s32.totalorder %s2301_s22, 0 }
  0x2a   : > { %p74_p10 = scmp.ne.s32.totalorder %s2285_s18, %s2281_s17  ;;  %s2819_s28 = smov (%p54_p7, %s52_s28), 0 }
  0x2b   : > { %2793 = sst [smem:[#allocation35_spill]] %s2819_s28  ;;  %p2463_p11 = por %p69_p9, %p68_p8 }
  0x2c   : > { %p2469_p12 = por %p75_p1, %p74_p10  ;;  %s56_s13 = ssub.s32 %s2297_s21, %s2819_s28 }
  0x2d   : > { %p306_p13 = scmp.eq.s32.totalorder %s2411_s23, 1  ;;  %p59_p0 = scmp.eq.s32.totalorder %s56_s13, 0 }
  0x2e   : > { %p312_p2 = scmp.eq.s32.totalorder %s1612_s24, 1  ;;  %p1766_p7 = scmp.lt.s32.totalorder %s2301_s22, 2 }
  0x2f   : > { %p2476_p4 = por %p306_p13, %p68_p8  ;;  %s2772_s16 = sand.u32 1, %s2289_s19  }
  0x30   : > { %s2482_s29 = scalar_select %p59_p0, %s2289_s19, %s61_s12  }
  0x31   : > { %p2484_p9 = por %p312_p2, %p74_p10  ;;  %s2491_s4 = sshll.u32 %s2772_s16, 3 }
  0x32   : > { %2797 = sst [smem:[#allocation36_spill]] %s2482_s29  ;;  %s2494_s5 = sshll.u32 %s2297_s21, 3 }
  0x33   : > { %s2798_s15 = scalar_select %p2484_p9, 1, 0 }
  0x34   : > { %p2498_p8 = pnand %p1766_p7, %p2463_p11  ;;  %s2776_s12 = sand.u32 1, %s2301_s22  }
  0x35   : > { %2799 = sst [smem:[#allocation37_spill]] %s2798_s15  ;;  %s468_s15 = scalar_lea.vmem [#allocation7], %s2491_s4 }
  0x36   : > { %s2801_s1 = sld [smem:[#allocation38_spill]]  ;;  %s476_s16 = sshll.u32 %s468_s15, 4  ;;  %s477_s16 = int_to_ptr.vmem [resolvable:$true] %s476_s16 }
  0x37   : > { %s2510_s21 = scalar_lea.sflag [#allocation8], %s2776_s12  ;;  %s2802_s6 = sld [smem:[#allocation41_spill]] }
  0x38   : > { %s2308_s7 = smov [#allocation15]   ;;  %s2803_s8 = sld [smem:[#allocation43_spill]] }
  0x39   : > { %s388_s13 = sshll.u32 %s2308_s7, 4  ;;  %s2804_s12 = smov 8   ;;  %s389_s13 = int_to_ptr.vmem [resolvable:$true] %s388_s13 }
  0x3a   : > { %s2805_s11 = smov 128   ;;  %s428_s7 = sshll.u32 %s2765_s9, 4  ;;  %s429_s7 = int_to_ptr.hbm [resolvable:$true] %s428_s7 }
  0x3b   : > { %s487_s14 = scalar_lea.vmem [#allocation9], %s2491_s4 }
  0x3c   : > { %s472_s28 = scalar_lea.hbm %s2801_s1, %s2494_s5  ;;  %s2310_s1 = smov 64  }
  0x3d   : > { %s474_s29 = sshll.u32 %s472_s28, 4  ;;  %s386_s10 = sshll.u32 %s2802_s6, 4  ;;  %s475_s29 = int_to_ptr.hbm [resolvable:$true] %s474_s29  ;;  %s387_s10 = int_to_ptr.hbm [resolvable:$true] %s386_s10 }
  0x3e   : > { %1746 = dma.hbm_to_vmem [thread:$0]  (!%p2498_p8), %s475_s29, 128, %s477_s16, %s2510_s21  }
  0x3f   : > { %s414_s15 = sshll.u32 %s2803_s8, 4  ;;  %s2309_s16 = smov [#allocation18]   ;;  %s415_s15 = int_to_ptr.hbm [resolvable:$true] %s414_s15 }
  0x40   : > { %1730 = dma.hbm_to_vmem [thread:$0]  (!%p2427_p5), %s387_s10, 512, %s389_s13, [#allocation14], %s2805_s11, %s2805_s11, %s2804_s12  }
  0x41   : > { %s416_s17 = sshll.u32 %s2309_s16, 4  ;;  %s2311_s28 = smov 4   ;;  %s417_s17 = int_to_ptr.vmem [resolvable:$true] %s416_s17 }
  0x42   : > { %1736 = dma.hbm_to_vmem [thread:$0]  (!%p2427_p5), %s415_s15, 256, %s417_s17, [#allocation17], %s2310_s1, %s2310_s1, %s2311_s28  }
  0x43   : > { %s2312_s6 = smov [#allocation19]   ;;  %s453_s12 = scalar_lea.hbm %s2756_s0, %s2494_s5 }
  0x44   : > { %s430_s8 = sshll.u32 %s2312_s6, 4  ;;  %s448_s13 = scalar_lea.vmem [#allocation4], %s2491_s4  ;;  %s431_s8 = int_to_ptr.vmem [resolvable:$true] %s430_s8 }
  0x45   : > { %1739 = dma.hbm_to_vmem [thread:$0]  (!%p2427_p5), %s429_s7, 256, %s431_s8, [#allocation20], %s2310_s1, %s2310_s1, %s2311_s28  }
  0x46   : > { %s457_s16 = sshll.u32 %s448_s13, 4  ;;  %s455_s29 = sshll.u32 %s453_s12, 4  ;;  %s458_s16 = int_to_ptr.vmem [resolvable:$true] %s457_s16  ;;  %s456_s29 = int_to_ptr.hbm [resolvable:$true] %s455_s29 }
  0x47   : > { %s2806_s15 = sand.u32 1, %s2289_s19   ;;  %s491_s8 = scalar_lea.hbm %s2758_s2, %s2494_s5 }
  0x48   : > { %s445_s17 = scalar_lea.sflag [#allocation5], %s2806_s15  ;;  %s495_s7 = sshll.u32 %s487_s14, 4  ;;  %s496_s7 = int_to_ptr.vmem [resolvable:$true] %s495_s7 }
  0x49   : > { %1743 = dma.hbm_to_vmem [thread:$0]  (!%p2498_p8), %s456_s29, 128, %s458_s16, %s445_s17  }
  0x4a   : > { %s493_s1 = sshll.u32 %s491_s8, 4  ;;  %s511_s11 = scalar_lea.hbm %s2759_s3, %s2494_s5  ;;  %s494_s1 = int_to_ptr.hbm [resolvable:$true] %s493_s1 }
  0x4b   : > { %1749 = dma.hbm_to_vmem [thread:$0]  (!%p2498_p8), %s494_s1, 128, %s496_s7, %s2510_s21  }
  0x4c   : > { %s506_s12 = scalar_lea.vmem [#allocation10], %s2491_s4  ;;  %s513_s15 = sshll.u32 %s511_s11, 4  ;;  %s514_s15 = int_to_ptr.hbm [resolvable:$true] %s513_s15 }
  0x4d   : > { %s515_s13 = sshll.u32 %s506_s12, 4  ;;  %s2807_s16 = sand.u32 1, %s2301_s22   ;;  %s516_s13 = int_to_ptr.vmem [resolvable:$true] %s515_s13 }
  0x4e   : > { %s503_s29 = scalar_lea.sflag [#allocation11], %s2807_s16  ;;  %524 = sbr.rel (%p2419_p3) target bundleno = 1172 (0x494), region = 60 }
  0x4f   : > { %1752 = dma.hbm_to_vmem [thread:$0]  (!%p2498_p8), %s514_s15, 128, %s516_s13, %s503_s29  }
  0x50   : > { %s2562_s17 = sand.u32 (!%p2419_p3), 1, %s2285_s18  }
  0x51   : > { %s2565_s21 = sshll.u32 (!%p2419_p3), %s2562_s17, 3  ;;  %s527_s4 = scalar_lea.sflag (!%p2419_p3), [#allocation5], %s2562_s17 }
  0x52   : > { %s530_s5 = scalar_lea.vmem (!%p2419_p3), [#allocation4], %s2565_s21 }
  0x53   : > { %2244 = dma.done.wait (%p2469_p12), %s527_s4, 128  }
  0x54   : > { %2246 = vsyncadd (%p2469_p12), %s527_s4, 4294967168  ;;  %s536_s27 = sand.u32 1, %s2411_s23   ;;  %s540_s6 = scalar_lea.vmem [#allocation7], %s2565_s21 }
  0x55   : > { %s537_s24 = scalar_lea.sflag [#allocation8], %s536_s27 }
  0x56   : > { %2248 = dma.done.wait (%p2469_p12), %s537_s24, 256  }
  0x57   : > { %2250 = vsyncadd (%p2469_p12), %s537_s24, 4294967040  ;;  %s550_s30 = scalar_lea.vmem [#allocation9], %s2565_s21  ;;  %s557_s8 = scalar_lea.sflag [#allocation11], %s536_s27 }
  0x58   : > { %s560_s14 = scalar_lea.vmem [#allocation10], %s2565_s21 }
  0x59   : > { %2252 = dma.done.wait (%p2469_p12), %s557_s8, 128  }
  0x5a   : > { %2254 = vsyncadd (%p2469_p12), %s557_s8, 4294967168 }
  0x5b   : > { %2256 = dma.done.wait (%p75_p1), [#allocation11], 512  }
  0x5c   : > { %2258 = vsyncadd (%p75_p1), [#allocation11], 4294966784 }
  0x5d   : > { %2260 = dma.done.wait (%p75_p1), [#allocation14], 1024  }
  0x5e   : > { %2262 = vsyncadd (%p75_p1), [#allocation14], 4294966272 }
  0x5f   : > { %2264 = dma.done.wait (%p75_p1), [#allocation17], 768  }
  0x60   : > { %2266 = vsyncadd (%p75_p1), [#allocation17], 4294966528 }
  0x61   : > { %2268 = dma.done.wait (%p75_p1), [#allocation20], 256  }
  0x62   : > { %2270 = vsyncadd (%p75_p1), [#allocation20], 4294967040  ;;  %v658_v0 = vld [vmem:[#allocation13 + $0x18] sm:$0xff]  ;;  %v657_v1 = vld [vmem:[#allocation13 + $0x10] sm:$0xff]  ;;  %vm659_vm0 = vcmask 261120   ;;  %vm746_vm1 = vcmask 64512  }
  0x63   : > { %v717_v2 = vld [vmem:[#allocation12 + $0x18] sm:$0xff]  ;;  %675 = vmatpush.msra.mxu0 %v658_v0  ;;  %v716_v3 = vld [vmem:[#allocation12 + $0x10] sm:$0xff]  ;;  %v656_v4 = vld [vmem:[#allocation13 + $0x8] sm:$0xff]  ;;  %s2313_s23 = smov 104   ;;  %s2314_s25 = smov 112   ;;  %vm800_vm2 = vcmask 31744  }
  0x64   : > { %734 = vmatpush.msra.mxu2 %v717_v2  ;;  %v715_v5 = vld [vmem:[#allocation12 + $0x8] sm:$0xff]  ;;  %v655_v6 = vld [vmem:[#allocation13] sm:$0xff]  ;;  %v654_v8 = vld [vmem:[%s540_s6] sm:$0xff]  ;;  %s2315_s7 = smov 120   ;;  %vm825_vm3 = vcmask 1043456   ;;  %s2316_s1 = smov 8  }
  0x65   : > { %676 = vmatpush.msra.mxu0 %v657_v1  ;;  %v714_v7 = vld [vmem:[#allocation12] sm:$0xff]  ;;  %v1044_v16 = vld [vmem:[#allocation18 + $0x8] sm:$0xf]  ;;  %v1180_v19 = vld [vmem:[#allocation18 + $0xc] sm:$0xf]  ;;  %s1641_s28 = sshll.u32 %s2562_s17, 5 }
  0x66   : > { %735 = vmatpush.msra.mxu2 %v716_v3  ;;  %v713_v9 = vld [vmem:[%s530_s5] sm:$0xff]  ;;  %v745_v23 = vld [vmem:[%s560_s14] sm:$0xff]  ;;  %vm876_vm4 = vcmask 97280   ;;  %s2675_s10 = scalar_lea.vmem [#allocation22], %s1641_s28  ;;  %s2317_s11 = smov 16   ;;  %vm1300_vm5 = vcmask 130048  }
  0x67   : > { %677 = vmatpush.msra.mxu0 %v656_v4  ;;  %v773_v13 = vld [vmem:[#allocation18] sm:$0xf]  ;;  %v907_v15 = vld [vmem:[#allocation18 + $0x4] sm:$0xf]  ;;  %v688_v30 = vld [vmem:[#allocation15 + $0x18] sm:$0xff]  ;;  %s2318_s12 = smov 24  }
  0x68   : > { %736 = vmatpush.msra.mxu2 %v715_v5  ;;  %v687_v31 = vld [vmem:[#allocation15 + $0x10] sm:$0xff]  ;;  %704 = vmatpush.msra.mxu1 %v688_v30  ;;  %v686_v32 = vld [vmem:[#allocation15 + $0x8] sm:$0xff]  ;;  %v685_v33 = vld [vmem:[#allocation15] sm:$0xff]  ;;  %vm1302_vm6 = vcmask 195584   ;;  %s1684_s13 = sshll.u32 %s2293_s20, 5  ;;  %s1366_s15 = sshll.u32 %s2675_s10, 4  ;;  %s1367_s15 = int_to_ptr.vmem [resolvable:$true] %s1366_s15 }
  0x69   : > { %678 = vmatpush.msra.mxu0 %v655_v6  ;;  %v684_v34 = vld [vmem:[%s550_s30] sm:$0xff]  ;;  %v821_v63 = vld [vmem:[#allocation19] sm:$0xf]  ;;  %s2808_s4 = sld [smem:[#allocation45_spill]]  ;;  %s1338_s24 = scalar_lea.sflag [#allocation23], %s2562_s17 }
  0x6a   : > { %737 = vmatpush.msra.mxu2 %v714_v7  ;;  %1642 = vmatmul.msk.f32.vlgmr.msra.gmra.mxu0 %vm659_vm0, %v654_v8 }
  0x6b   : > { %1644 = vmatmul.msk.f32.vlgmr.msra.gmra.mxu2 %vm659_vm0, %v713_v9  ;;  %705 = vmatpush.msra.mxu1 %v687_v31 }
  0x6c   : > { %1649 = vmatpush.msk.msrb.mxu0 %vm825_vm3, %v821_v63 }
  0x6d   : > { %706 = vmatpush.msra.mxu1 %v686_v32 }
  0x6f   : > { %707 = vmatpush.msra.mxu1 %v685_v33  ;;  %s1365_s5 = scalar_lea.hbm %s2808_s4, %s1684_s13 }
  0x70   : > { %1643 = vmatmul.msk.f32.vlgmr.msra.gmra.mxu1 %vm659_vm0, %v684_v34  ;;  %s1368_s27 = sshll.u32 %s1365_s5, 4  ;;  %s1369_s27 = int_to_ptr.hbm [resolvable:$true] %s1368_s27 }
  0x71   : > { %s2177_s6 = sshra.s32 %s1369_s27, 4  ;;  %s2178_s6 = int_to_ptr.hbm [resolvable:$true] %s2177_s6 }
  0x72   : > { %s2179_s30 = scalar_lea.hbm %s2178_s6, 32  ;;  %p2184_p10 = scmp.lt.s32.totalorder %s2178_s6, %s2808_s4 }
  0x73   : > { %p2180_p1 = scmp.ne.s32.totalorder %s2178_s6, %s2179_s30 }
  0x75   : > { %p2181_p3 = pnand %p2180_p1, %p2476_p4 }
  0x77   : > { %p2182_p5 = pneg %p2181_p3 }
  0xe7   : > { %v680_v10 = vpop.f32.mrf.mxu0 }
  0xe8   : > { %683 = vst.msk [vmem:[#allocation2] sm:$0xff] %vm659_vm0, %v680_v10 }
  0xed   : > { %v709_v61 = vpop.f32.mrf.mxu1 }
  0xee   : > { %v739_v11 = vpop.f32.mrf.mxu2  ;;  %712 = vst.msk [vmem:[#allocation3] sm:$0xff] %vm659_vm0, %v709_v61 }
  0xef   : > { %v743_v12 = vld [vmem:[#allocation2] sm:$0xff]  ;;  %v742_v14 = vmul.f32 0.35355338, %v739_v11 }
  0xf0   : > { %1153 = vrot.lane.b32.xlu2 %v743_v12, %s2313_s23  ;;  %1017 = vrot.lane.b32.xlu1 %v743_v12, %s2314_s25 }
  0xf1   : > { %880 = vrot.lane.b32.xlu0 %v743_v12, %s2315_s7  ;;  %1645 = vmatpush.xpose.msk.msra.mxu3 %vm746_vm1, %v743_v12 }
  0xf4   : > { %1646 = vmatmul.msk.f32.vlgmr.msra.gmra.mxu3 %vm746_vm1, %v742_v14 }
  0xf5   : > { %1647 = vmatpush.xpose.msk.msrb.mxu3 %vm746_vm1, %v773_v13  ;;  %v744_v0 = vld [vmem:[#allocation3] sm:$0xff] }
  0xf6   : > { %867 = vmatpush.msrb.mxu1 %v744_v0 }
  0xf8   : > { %1151 = vrot.lane.b32.xlu2 %v742_v14, %s2313_s23  ;;  %1015 = vrot.lane.b32.xlu1 %v742_v14, %s2314_s25 }
  0xf9   : > { %878 = vrot.lane.b32.xlu0 %v742_v14, %s2315_s7  ;;  %1654 = vmatpush.xpose.msk.msra.mxu3 %vm746_vm1, %v907_v15 }
  0xfc   : > { %1648 = vmatmul.msk.f32.vlgmr.msrb.gmra.mxu3 %vm746_vm1, %v742_v14 }
  0xfd   : > { %1662 = vmatpush.xpose.msk.msrb.mxu3 %vm746_vm1, %v1044_v16 }
 0x14a   : > { %v1154_v21 = vpop.permute.xlu2 %1153 }
 0x152   : > { %v1152_v27 = vpop.permute.xlu2 %1151 }
 0x162   : > { %v1018_v17 = vpop.permute.xlu1 %1017 }
 0x163   : > { %v881_v18 = vpop.permute.xlu0 %880 }
 0x164   : > { %1652 = vmatpush.xpose.msk.msrb.mxu2 %vm746_vm1, %v881_v18 }
 0x168   : > { %1660 = vmatpush.xpose.msk.msra.mxu2 %vm746_vm1, %v1018_v17 }
 0x16a   : > { %v1016_v22 = vpop.permute.xlu1 %1015 }
 0x16b   : > { %v879_v20 = vpop.permute.xlu0 %878 }
 0x16c   : > { %1653 = vmatmul.msk.f32.vlgmr.msrb.gmra.mxu2 %vm746_vm1, %v879_v20  ;;  %1655 = vmatmul.msk.f32.vlgmr.msra.gmra.mxu3 %vm746_vm1, %v879_v20 }
 0x16d   : > { %1668 = vmatpush.xpose.msk.msrb.mxu2 %vm746_vm1, %v1154_v21  ;;  %1670 = vmatpush.xpose.msk.msra.mxu3 %vm746_vm1, %v1180_v19 }
 0x174   : > { %1661 = vmatmul.msk.f32.vlgmr.msra.gmra.mxu2 %vm746_vm1, %v1016_v22  ;;  %1663 = vmatmul.msk.f32.vlgmr.msrb.gmra.mxu3 %vm746_vm1, %v1016_v22 }
 0x177   : > { %v770_v24 = vpop.f32.mrf.mxu3 }
 0x178   : > { %v771_v25 = vadd.f32 %v770_v24, %v745_v23 }
 0x17a   : > { %v797_v26 = vsel %vm746_vm1, %v771_v25, -inf }
 0x17b   : > { %798 = vmax.xlane.f32.xlu0 %v797_v26 }
 0x17c   : > { %1669 = vmatmul.msk.f32.vlgmr.msrb.gmra.mxu2 %vm746_vm1, %v1152_v27  ;;  %1671 = vmatmul.msk.f32.vlgmr.msra.gmra.mxu3 %vm746_vm1, %v1152_v27 }
 0x17f   : > { %v794_v28 = vpop.f32.mrf.mxu3 }
 0x180   : > { %v801_v29 = vsel %vm800_vm2, %v794_v28, -inf }
 0x181   : > { %802 = vmax.xlane.f32.xlu1 %v801_v29 }
 0x1ee   : > { %v799_v38 = vpop.xlane.xlu0 %798 }
 0x1ef   : > { %v903_v35 = vpop.f32.mrf.mxu2  ;;  %v928_v36 = vpop.f32.mrf.mxu3 }
 0x1f0   : > { %v934_v37 = vsel %vm800_vm2, %v928_v36, -inf  ;;  %v904_v39 = vadd.f32 %v903_v35, %v745_v23 }
 0x1f1   : > { %935 = vmax.xlane.f32.xlu2 %v934_v37 }
 0x1f2   : > { %v931_v46 = vsel %vm746_vm1, %v904_v39, -inf }
 0x1f4   : > { %v803_v40 = vpop.xlane.xlu1 %802 }
 0x1f5   : > { %v804_v41 = vmax.f32 %v799_v38, %v803_v40  ;;  %v1092_v40 = vld [vmem:[#allocation19 + $0x8] sm:$0xf] }
 0x1f7   : > { %v805_v42 = vsub.f32 %v771_v25, %v804_v41  ;;  %v1040_v43 = vpop.f32.mrf.mxu2  ;;  %v1065_v44 = vpop.f32.mrf.mxu3  ;;  %v808_v49 = vsub.f32 %v794_v28, %v804_v41 }
 0x1f8   : > { %v1041_v45 = vadd.f32 %v1040_v43, %v745_v23  ;;  %v1071_v47 = vsel %vm800_vm2, %v1065_v44, -inf }
 0x1f9   : > { %v806_v48 = vmul.f32 1.442695, %v805_v42  ;;  %932 = vmax.xlane.f32.xlu2 %v931_v46  ;;  %1072 = vmax.xlane.f32.xlu1 %v1071_v47  ;;  %v809_v51 = vmul.f32 1.442695, %v808_v49 }
 0x1fa   : > { %v1068_v50 = vsel %vm746_vm1, %v1041_v45, -inf }
 0x1fb   : > { %1839 = vpow2.f32 %v806_v48  ;;  %1069 = vmax.xlane.f32.xlu0 %v1068_v50  ;;  %v1228_v50 = vld [vmem:[#allocation19 + $0xc] sm:$0xf] }
 0x1fc   : > { %1841 = vpow2.f32 %v809_v51 }
 0x1ff   : > { %v1176_v52 = vpop.f32.mrf.mxu2  ;;  %v1201_v53 = vpop.f32.mrf.mxu3 }
 0x200   : > { %v1177_v54 = vadd.f32 %v1176_v52, %v745_v23  ;;  %v1207_v57 = vsel %vm800_vm2, %v1201_v53, -inf }
 0x201   : > { %v2639_v55 = vpop.eup %1839 }
 0x202   : > { %v1204_v56 = vsel %vm746_vm1, %v1177_v54, -inf  ;;  %v811_v58 = vsel %vm746_vm1, %v2639_v55, 0.0  ;;  %v1842_v59 = vpop.eup %1841 }
 0x203   : > { %1205 = vmax.xlane.f32.xlu2 %v1204_v56  ;;  %1208 = vmax.xlane.f32.xlu0 %v1207_v57  ;;  %v814_v60 = vsel %vm800_vm2, %v1842_v59, 0.0 }
 0x204   : > { %812 = vadd.xlane.f32.xlu1 %v811_v58 }
 0x20b   : > { %815 = vadd.xlane.f32.xlu2 %v814_v60 }
 0x264   : > { %v936_v62 = vpop.xlane.xlu2 %935 }
 0x26c   : > { %v933_v1 = vpop.xlane.xlu2 %932  ;;  %v1073_v3 = vpop.xlane.xlu1 %1072 }
 0x26d   : > { %v937_v2 = vmax.f32 %v933_v1, %v936_v62 }
 0x26e   : > { %v1070_v4 = vpop.xlane.xlu0 %1069 }
 0x26f   : > { %v938_v5 = vsub.f32 %v904_v39, %v937_v2  ;;  %v941_v6 = vsub.f32 %v928_v36, %v937_v2  ;;  %v1074_v7 = vmax.f32 %v1070_v4, %v1073_v3  ;;  %v955_v39 = vld [vmem:[#allocation19 + $0x4] sm:$0xf] }
 0x270   : > { %1656 = vmatpush.msk.msra.mxu0 %vm825_vm3, %v955_v39 }
 0x271   : > { %v939_v8 = vmul.f32 1.442695, %v938_v5  ;;  %v942_v9 = vmul.f32 1.442695, %v941_v6  ;;  %v1075_v10 = vsub.f32 %v1041_v45, %v1074_v7  ;;  %v1078_v11 = vsub.f32 %v1065_v44, %v1074_v7 }
 0x273   : > { %1843 = vpow2.f32 %v939_v8  ;;  %v1076_v12 = vmul.f32 1.442695, %v1075_v10  ;;  %v1079_v13 = vmul.f32 1.442695, %v1078_v11 }
 0x274   : > { %1845 = vpow2.f32 %v942_v9 }
 0x275   : > { %1847 = vpow2.f32 %v1076_v12 }
 0x276   : > { %v1206_v14 = vpop.xlane.xlu2 %1205  ;;  %v1209_v15 = vpop.xlane.xlu0 %1208  ;;  %1849 = vpow2.f32 %v1079_v13 }
 0x277   : > { %v1210_v16 = vmax.f32 %v1206_v14, %v1209_v15  ;;  %v813_v27 = vpop.xlane.xlu1 %812  ;;  %v1307_v14 = vld [vmem:[#allocation16 + $0x18] sm:$0xff]  ;;  %v1306_v15 = vld [vmem:[#allocation16 + $0x10] sm:$0xff] }
 0x278   : > { %1323 = vmatpush.msra.mxu2 %v1307_v14 }
 0x279   : > { %v2648_v17 = vpop.eup %1843  ;;  %v1211_v18 = vsub.f32 %v1177_v54, %v1210_v16  ;;  %v1214_v19 = vsub.f32 %v1201_v53, %v1210_v16  ;;  %v1305_v16 = vld [vmem:[#allocation16 + $0x8] sm:$0xff] }
 0x27a   : > { %v1846_v20 = vpop.eup %1845  ;;  %v944_v21 = vsel %vm746_vm1, %v2648_v17, 0.0  ;;  %1324 = vmatpush.msra.mxu2 %v1306_v15 }
 0x27b   : > { %v2652_v22 = vpop.eup %1847  ;;  %v1212_v23 = vmul.f32 1.442695, %v1211_v18  ;;  %945 = vadd.xlane.f32.xlu0 %v944_v21  ;;  %v947_v24 = vsel %vm800_vm2, %v1846_v20, 0.0  ;;  %v1215_v25 = vmul.f32 1.442695, %v1214_v19 }
 0x27c   : > { %948 = vadd.xlane.f32.xlu1 %v947_v24  ;;  %v1081_v26 = vsel %vm746_vm1, %v2652_v22, 0.0  ;;  %v1850_v29 = vpop.eup %1849  ;;  %1325 = vmatpush.msra.mxu2 %v1305_v16 }
 0x27d   : > { %1851 = vpow2.f32 %v1212_v23  ;;  %1082 = vadd.xlane.f32.xlu2 %v1081_v26  ;;  %v1084_v31 = vsel %vm800_vm2, %v1850_v29, 0.0 }
 0x27e   : > { %v816_v28 = vpop.xlane.xlu2 %815  ;;  %1853 = vpow2.f32 %v1215_v25 }
 0x27f   : > { %v817_v30 = vadd.f32 %v816_v28, %v813_v27 }
 0x281   : > { %1855 = vrcp.f32 %v817_v30 }
 0x283   : > { %v1852_v32 = vpop.eup %1851  ;;  %1085 = vadd.xlane.f32.xlu0 %v1084_v31 }
 0x284   : > { %v1217_v33 = vsel %vm746_vm1, %v1852_v32, 0.0  ;;  %v1854_v34 = vpop.eup %1853 }
 0x285   : > { %1218 = vadd.xlane.f32.xlu2 %v1217_v33  ;;  %v1220_v38 = vsel %vm800_vm2, %v1854_v34, 0.0 }
 0x287   : > { %v1856_v35 = vpop.eup %1855 }
 0x288   : > { %v820_v36 = vmul.f32 %v1856_v35, %v1842_v59  ;;  %v819_v37 = vmul.f32 %v1856_v35, %v2639_v55 }
 0x28a   : > { %1650 = vmatmul.msk.f32.vlgmr.msrb.gmra.mxu0 %vm800_vm2, %v820_v36  ;;  %1651 = vmatmul.msk.f32.vlgmr.msrb.gmra.mxu1 %vm746_vm1, %v819_v37 }
 0x28b   : > { %1221 = vadd.xlane.f32.xlu0 %v1220_v38  ;;  %1664 = vmatpush.msk.msrb.mxu0 %vm825_vm3, %v1092_v40 }
 0x295   : > { %983 = vrot.lane.b32.xlu1 %v744_v0, %s2315_s7 }
 0x29d   : > { %1119 = vrot.lane.b32.xlu2 %v744_v0, %s2314_s25 }
 0x29f   : > { %1255 = vrot.lane.b32.xlu0 %v744_v0, %s2313_s23  ;;  %s2183_s23 = scalar_lea.hbm %s2808_s4, 64 }
 0x2a0   : > { %p2185_p11 = scmp.lt.s32.totalorder %s2183_s23, %s2179_s30 }
 0x2a2   : > { %p2186_p12 = por %p2185_p11, %p2184_p10 }
 0x2a4   : > { %p2187_p13 = pnand %p2186_p12, %p2182_p5 }
 0x2a5   : > { %872 = vrot.lane.b32.xlu2 %v820_v36, %s2316_s1 }
 0x2ee   : > { %v946_v41 = vpop.xlane.xlu0 %945 }
 0x2ef   : > { %v949_v42 = vpop.xlane.xlu1 %948 }
 0x2f0   : > { %v950_v43 = vadd.f32 %v949_v42, %v946_v41  ;;  %v1083_v44 = vpop.xlane.xlu2 %1082 }
 0x2f2   : > { %1857 = vrcp.f32 %v950_v43 }
 0x2f6   : > { %v1086_v45 = vpop.xlane.xlu0 %1085 }
 0x2f7   : > { %v1087_v46 = vadd.f32 %v1086_v45, %v1083_v44 }
 0x2f8   : > { %v1858_v47 = vpop.eup %1857  ;;  %v1219_v48 = vpop.xlane.xlu2 %1218 }
 0x2f9   : > { %v953_v49 = vmul.f32 %v1858_v47, %v1846_v20  ;;  %1859 = vrcp.f32 %v1087_v46  ;;  %v952_v58 = vmul.f32 %v1858_v47, %v2648_v17  ;;  %v1304_v17 = vld [vmem:[#allocation16] sm:$0xff] }
 0x2fa   : > { %1326 = vmatpush.msra.mxu2 %v1304_v17 }
 0x2fb   : > { %1657 = vmatmul.msk.f32.vlgmr.msra.gmra.mxu0 %vm800_vm2, %v953_v49 }
 0x2fc   : > { %1672 = vmatpush.msk.msra.mxu0 %vm825_vm3, %v1228_v50 }
 0x2fe   : > { %v1222_v51 = vpop.xlane.xlu0 %1221 }
 0x2ff   : > { %v1860_v52 = vpop.eup %1859  ;;  %v1223_v53 = vadd.f32 %v1222_v51, %v1219_v48 }
 0x300   : > { %v1090_v54 = vmul.f32 %v1860_v52, %v1850_v29  ;;  %v1120_v55 = vpop.permute.xlu2 %1119  ;;  %v1089_v62 = vmul.f32 %v1860_v52, %v2652_v22 }
 0x301   : > { %1861 = vrcp.f32 %v1223_v53 }
 0x303   : > { %1665 = vmatmul.msk.f32.vlgmr.msrb.gmra.mxu0 %vm800_vm2, %v1090_v54 }
 0x307   : > { %v1862_v56 = vpop.eup %1861  ;;  %v984_v57 = vpop.permute.xlu1 %983 }
 0x308   : > { %1004 = vmatpush.msra.mxu1 %v984_v57  ;;  %v873_v59 = vpop.permute.xlu2 %872  ;;  %v1226_v60 = vmul.f32 %v1862_v56, %v1854_v34  ;;  %v1225_v0 = vmul.f32 %v1862_v56, %v1852_v32  ;;  %v846_v3 = vpop.f32.mrf.mxu0 }
 0x309   : > { %v875_v61 = vsel %vm746_vm1, %v819_v37, %v873_v59  ;;  %1658 = vmatmul.msk.f32.vlgmr.msra.gmra.mxu1 %vm746_vm1, %v952_v58  ;;  %v869_v4 = vpop.f32.mrf.mxu1 }
 0x30a   : > { %1140 = vmatpush.msrb.mxu1 %v1120_v55  ;;  %877 = vst.msk [vmem:[%s2675_s10] sm:$0xff] %vm876_vm4, %v875_v61  ;;  %1281 = vrot.lane.b32.xlu2 %v1226_v60, %s2316_s1  ;;  %v870_v20 = vadd.f32 %v869_v4, %v846_v3 }
 0x30b   : > { %1673 = vmatmul.msk.f32.vlgmr.msra.gmra.mxu0 %vm800_vm2, %v1226_v60 }
 0x311   : > { %v1256_v63 = vpop.permute.xlu0 %1255  ;;  %1666 = vmatmul.msk.f32.vlgmr.msrb.gmra.mxu1 %vm746_vm1, %v1089_v62 }
 0x312   : > { %1276 = vmatpush.msra.mxu1 %v1256_v63 }
 0x319   : > { %1674 = vmatmul.msk.f32.vlgmr.msra.gmra.mxu1 %vm746_vm1, %v1225_v0 }
 0x364   : > { %v1282_v1 = vpop.permute.xlu2 %1281 }
 0x365   : > { %v1284_v2 = vsel %vm746_vm1, %v1225_v0, %v1282_v1 }
 0x366   : > { %1675 = vst.msk [vmem:[%s2675_s10 + $0x18] sm:$0xff] %vm876_vm4, %v1284_v2 }
 0x378   : > { %v979_v5 = vpop.f32.mrf.mxu0 }
 0x380   : > { %v1116_v8 = vpop.f32.mrf.mxu0 }
 0x386   : > { %v1006_v6 = vpop.f32.mrf.mxu1 }
 0x387   : > { %v1007_v7 = vadd.f32 %v1006_v6, %v979_v5 }
 0x388   : > { %v1252_v11 = vpop.f32.mrf.mxu0 }
 0x389   : > { %1288 = vrot.lane.b32.xlu1 %v1007_v7, %s2316_s1 }
 0x38e   : > { %v1142_v9 = vpop.f32.mrf.mxu1 }
 0x38f   : > { %v1143_v10 = vadd.f32 %v1142_v9, %v1116_v8 }
 0x391   : > { %1292 = vrot.lane.b32.xlu1 %v1143_v10, %s2317_s11 }
 0x396   : > { %v1278_v12 = vpop.f32.mrf.mxu1 }
 0x397   : > { %v1279_v13 = vadd.f32 %v1278_v12, %v1252_v11 }
 0x399   : > { %1009 = vrot.lane.b32.xlu1 %v953_v49, %s2316_s1  ;;  %1296 = vrot.lane.b32.xlu0 %v1279_v13, %s2318_s12 }
 0x3a1   : > { %1145 = vrot.lane.b32.xlu0 %v1090_v54, %s2316_s1 }
 0x3fb   : > { %v1289_v18 = vpop.permute.xlu1 %1288 }
 0x3fc   : > { %v1299_v21 = vsel %vm746_vm1, %v870_v20, %v1289_v18 }
 0x403   : > { %v1293_v19 = vpop.permute.xlu1 %1292 }
 0x404   : > { %v1301_v22 = vsel %vm1300_vm5, %v1299_v21, %v1293_v19 }
 0x40b   : > { %v1010_v23 = vpop.permute.xlu1 %1009  ;;  %v1297_v24 = vpop.permute.xlu0 %1296 }
 0x40c   : > { %v1012_v25 = vsel %vm746_vm1, %v952_v58, %v1010_v23  ;;  %v1303_v26 = vsel %vm1302_vm6, %v1301_v22, %v1297_v24 }
 0x40d   : > { %1659 = vst.msk [vmem:[%s2675_s10 + $0x8] sm:$0xff] %vm876_vm4, %v1012_v25  ;;  %1676 = vmatmul.msk.f32.vlgmr.msra.gmra.mxu2 %vm659_vm0, %v1303_v26 }
 0x413   : > { %v1146_v27 = vpop.permute.xlu0 %1145 }
 0x414   : > { %v1148_v28 = vsel %vm746_vm1, %v1089_v62, %v1146_v27 }
 0x415   : > { %1667 = vst.msk [vmem:[%s2675_s10 + $0x10] sm:$0xff] %vm876_vm4, %v1148_v28 }
 0x416   : > { %2190 = shalt.err (!%p2187_p13)
}
 0x417   : > { %s2319_s28 = smov 128   ;;  %s1679_s10 = sshll.u32 %s2293_s20, 3 }
 0x418   : > { %1718 = dma.vmem_to_hbm [thread:$0]  (%p2476_p4), %s1367_s15, 512, %s1369_s27, %s1338_s24, %s2319_s28, %s2319_s28, %s2316_s1  }
 0x419   : > { %s2809_s13 = sld [smem:[#allocation44_spill]]  ;;  %s642_s29 = scalar_lea.vmem [#allocation21], %s2565_s21 }
 0x41a   : > { %s1351_s5 = sshll.u32 %s642_s29, 4  ;;  %s1333_s30 = scalar_lea.sflag [#allocation6], %s2562_s17  ;;  %s1352_s5 = int_to_ptr.vmem [resolvable:$true] %s1351_s5 }
 0x41f   : > { %s1349_s16 = scalar_lea.hbm %s2809_s13, %s1679_s10  ;;  %s2211_s15 = scalar_lea.hbm %s2809_s13, 16 }
 0x420   : > { %s1353_s6 = sshll.u32 %s1349_s16, 4  ;;  %s1354_s6 = int_to_ptr.hbm [resolvable:$true] %s1353_s6 }
 0x421   : > { %s2205_s8 = sshra.s32 %s1354_s6, 4  ;;  %s2206_s8 = int_to_ptr.hbm [resolvable:$true] %s2205_s8 }
 0x422   : > { %s2207_s14 = scalar_lea.hbm %s2206_s8, 8  ;;  %p2212_p8 = scmp.lt.s32.totalorder %s2206_s8, %s2809_s13 }
 0x423   : > { %p2208_p0 = scmp.ne.s32.totalorder %s2206_s8, %s2207_s14  ;;  %p2213_p1 = scmp.lt.s32.totalorder %s2211_s15, %s2207_s14 }
 0x425   : > { %p2209_p2 = pnand %p2208_p0, %p2476_p4  ;;  %p2214_p3 = por %p2213_p1, %p2212_p8 }
 0x427   : > { %p2210_p7 = pneg %p2209_p2 }
 0x429   : > { %p2215_p5 = pnand %p2214_p3, %p2210_p7 }
 0x490   : > { %v1328_v29 = vpop.f32.mrf.mxu2 }
 0x491   : > { %1331 = vst.msk [vmem:[%s642_s29] sm:$0xff] %vm659_vm0, %v1328_v29 }
 0x492   : > { %2218 = shalt.err (!%p2215_p5)
}
 0x493   : > { %1717 = dma.vmem_to_hbm [thread:$0]  (%p2476_p4), %s1352_s5, 128, %s1354_s6, %s1333_s30  }
 0x494 PF: > { %s2810_s17 = sld [smem:[#allocation33_spill]]  ;;  %p1754_p10 = pnand %p1620_p6, %p2484_p9 }
 0x496   : > { %p1755_p11 = pneg %p1754_p10 }
 0x49a   : > { %s1383_s23 = sand.u32 1, %s2810_s17  }
 0x49b   : > { %s1384_s25 = scalar_lea.sflag [#allocation6], %s1383_s23 }
 0x49c   : > { %2272 = dma.done.wait (%p1755_p11), %s1384_s25, 128  }
 0x49d   : > { %2274 = vsyncadd (%p1755_p11), %s1384_s25, 4294967168  ;;  %s1394_s7 = scalar_lea.sflag [#allocation23], %s1383_s23 }
 0x49e   : > { %2276 = dma.done.wait (%p1755_p11), %s1394_s7, 512  }
 0x49f   : > { %2278 = vsyncadd (%p1755_p11), %s1394_s7, 4294966784  ;;  %s40_s22 = sadd.s32 1, %s2301_s22   ;;  %s2812_s26 = sld [smem:[#allocation36_spill]] }
 0x4a0   : > { %p37_p12 = scmp.ge.s32.totalorder %s40_s22, 4   ;;  %s2813_s20 = sld [smem:[#allocation34_spill]] }
 0x4a1   : > { %s2814_s21 = sld [smem:[#allocation35_spill]]  ;;  %s2815_s17 = smov %s2285_s18 }
 0x4a2   : > { %s2816_s18 = smov %s2289_s19  ;;  %39 = sbr.rel (!%p37_p12) target bundleno = 24 (0x18), region = 196 }
 0x4a5   : > { %s2817_s19 = smov %s2812_s26 }
 0x4a7   :  { %1400 = vsyncpa [#allocation5], 1 }
 0x4a8   :  { %1402 = vsyncpa [#allocation5 + $0x1], 1 }
 0x4a9   :  { %1403 = vsyncpa [#allocation8], 1 }
 0x4aa   :  { %1405 = vsyncpa [#allocation8 + $0x1], 1 }
 0x4ab   :  { %1406 = vsyncpa [#allocation11], 1 }
 0x4ac   :  { %1408 = vsyncpa [#allocation11 + $0x1], 1 }
 0x4ad   :  { %1409 = vsyncpa [#allocation14], 1 }
 0x4ae   :  { %1410 = vsyncpa [#allocation17], 1 }
 0x4af   :  { %1411 = vsyncpa [#allocation20], 1 }
 0x4b0   :  { %1412 = vsyncpa [#allocation6], 1 }
 0x4b1   :  { %1414 = vsyncpa [#allocation6 + $0x1], 1 }
 0x4b2   :  { %1415 = vsyncpa [#allocation23], 1 }
 0x4b3   :  { %1417 = vsyncpa [#allocation23 + $0x1], 1 }

</bundles_post_ra>
